<compile_context>
chip_gen: v7x
topology: tpu7x:2x2x1
jax: 0.10.0
libtpu: 0.0.40
codegen_flags: <defaults>
</compile_context>

<pallas_src>
import functools

import jax
import jax.numpy as jnp
from jax.experimental import pallas as pl
from jax.experimental.pallas import tpu as pltpu

NEG_SLOPE = 0.01   # torch.nn.LeakyReLU default
LANE = 128         # TPU lane width


def _round_up(n, m):
    return ((n + m - 1) // m) * m


def _leaky_relu(x):
    return jnp.where(x > 0, x, NEG_SLOPE * x)


def seqmodel_head_kernel(x_ref, w1_ref, w2_ref, w3_ref, b_ref, out_ref,
                         *, i_pad, h_pad):
    """x: [TILE_B, 768] (producer dtype); weights pre-transposed/padded bf16.

    Output slab [TILE_B, h_pad]: encoding in cols [0, half), logits in cols
    [half, half+2) -- the classifier weights were pre-shifted so `h2 + logits`
    places both without any lane movement."""
    x = x_ref[...].astype(jnp.bfloat16)            # in-kernel cast (VPU, hidden under DMA)
    b1 = b_ref[0:1, :i_pad]
    b2 = b_ref[1:2, :h_pad]
    b3 = b_ref[2:3, :h_pad]

    h1 = jnp.dot(x, w1_ref[...], preferred_element_type=jnp.float32) + b1
    h1 = _leaky_relu(h1)                           # [TILE_B, i_pad] f32
    h2 = jnp.dot(h1.astype(jnp.bfloat16), w2_ref[...],
                 preferred_element_type=jnp.float32) + b2
    h2 = _leaky_relu(h2)                           # [TILE_B, h_pad] f32 (cols >= half are 0)
    logits = jnp.dot(h2.astype(jnp.bfloat16), w3_ref[...],
                     preferred_element_type=jnp.float32) + b3   # nonzero only in cols [half, half+2)
    out_ref[...] = (h2 + logits).astype(out_ref.dtype)          # one lane-dense store


def prepare_params(params, n_classes=2, compute_dtype=jnp.bfloat16):
    """Pad/transpose/pack weights for the kernel.

    params hold PyTorch-Linear weights pre-transposed to [in, out].
    Zero padding is exact: LeakyReLU(0) == 0 and padded bias entries are 0.
    The classifier (w3/b3) is shifted to output columns [half, half+n_classes)
    so the kernel can fuse encoding + logits into one output slab."""
    w1, w2, w3 = params["w1"], params["w2"], params["w3"]
    in_f, interm = w1.shape
    half = w2.shape[1]
    assert w3.shape == (half, n_classes)

    i_pad = _round_up(interm, LANE)
    h_pad = _round_up(half + n_classes, LANE)      # slab holds enc + logits
    max_pad = max(i_pad, h_pad)

    def pad2(a, rows, cols):
        return jnp.pad(a, ((0, rows - a.shape[0]), (0, cols - a.shape[1])))

    w3_shift = jnp.zeros((h_pad, h_pad), jnp.float32)
    w3_shift = w3_shift.at[:half, half:half + n_classes].set(w3)
    b3_shift = jnp.zeros((h_pad,), jnp.float32)
    b3_shift = b3_shift.at[half:half + n_classes].set(params["b3"][0])

    bias = jnp.zeros((8, max_pad), jnp.float32)    # rows padded to 8 sublanes
    bias = bias.at[0, :interm].set(params["b1"][0])
    bias = bias.at[1, :half].set(params["b2"][0])
    bias = bias.at[2, :h_pad].set(b3_shift)

    prep = {
        "w1": pad2(w1, in_f, i_pad).astype(compute_dtype),
        "w2": pad2(w2, i_pad, h_pad).astype(compute_dtype),
        "w3": w3_shift.astype(compute_dtype),
        "bias": bias,                              # f32
    }
    meta = dict(in_features=in_f, interm=interm, half=half,
                n_classes=n_classes, i_pad=i_pad, h_pad=h_pad)
    return prep, meta


def seqmodel_forward(x, prep, meta, tile_b=1024, min_pallas_batch=0):
    """x: [B, 768] CLS embeddings (f32 or bf16). Returns (logits [B,2], enc [B,half])."""
    B, D = x.shape
    i_pad, h_pad = meta["i_pad"], meta["h_pad"]
    half, n_classes = meta["half"], meta["n_classes"]

    if B < min_pallas_batch:
        # TODO(synk): at the shipped batch (~2) this head is cheaper fused into
        # the transformer epilogue by XLA than as a standalone pallas_call.
        xb = x.astype(jnp.bfloat16)
        h1 = _leaky_relu(jnp.dot(xb, prep["w1"],
                                 preferred_element_type=jnp.float32)
                         + prep["bias"][0:1, :i_pad])
        h2 = _leaky_relu(jnp.dot(h1.astype(jnp.bfloat16), prep["w2"],
                                 preferred_element_type=jnp.float32)
                         + prep["bias"][1:2, :h_pad])
        out = h2 + (jnp.dot(h2.astype(jnp.bfloat16), prep["w3"],
                            preferred_element_type=jnp.float32)
                    + prep["bias"][2:3, :h_pad])
        return out[:, half:half + n_classes], out[:, :half]

    # Batch tiling: x stays in its producer dtype (no wrapper cast round-trip);
    # rows padded to 16-sublane granularity (bf16 packing inside the kernel).
    TILE_B = min(tile_b, _round_up(B, 16))
    if B >= 512:
        # Keep >= 2 grid steps so the "parallel" batch axis shards across the
        # two v7x TensorCores (harmless single-TC on v5e/v6e).
        TILE_B = min(TILE_B, _round_up((B + 1) // 2, 16))
    B_pad = _round_up(B, TILE_B)
    x_p = x if B_pad == B else jnp.pad(x, ((0, B_pad - B), (0, 0)))
    grid = (B_pad // TILE_B,)

    x_bytes = int(x_p.size) * x_p.dtype.itemsize
    weight_bytes = sum(int(prep[k].size) * prep[k].dtype.itemsize
                       for k in ("w1", "w2", "w3", "bias"))
    out_bytes = B_pad * h_pad * 4
    flops = 2 * B_pad * (D * i_pad + i_pad * h_pad + h_pad * h_pad)

    # Explicit scoped-VMEM budget: double-buffered x/out blocks + weights
    # (double-buffered, with margin) + headroom for h1/h2 temporaries.
    vmem_limit = min(
        2 * TILE_B * (D + h_pad) * 4 + 4 * weight_bytes + (8 << 20),
        40 << 20)

    kernel = functools.partial(seqmodel_head_kernel, i_pad=i_pad, h_pad=h_pad)

    out_pad = pl.pallas_call(
        kernel,
        out_shape=jax.ShapeDtypeStruct((B_pad, h_pad), jnp.float32),
        grid=grid,
        in_specs=[
            pl.BlockSpec((TILE_B, D), lambda i: (i, 0)),      # x: tiled over batch
            pl.BlockSpec((D, i_pad), lambda i: (0, 0)),       # w1: VMEM-resident
            pl.BlockSpec((i_pad, h_pad), lambda i: (0, 0)),   # w2
            pl.BlockSpec((h_pad, h_pad), lambda i: (0, 0)),   # w3 (pre-shifted)
            pl.BlockSpec((8, prep["bias"].shape[1]), lambda i: (0, 0)),  # biases
        ],
        out_specs=pl.BlockSpec((TILE_B, h_pad), lambda i: (i, 0)),
        compiler_params=pltpu.CompilerParams(
            dimension_semantics=("parallel",),
            vmem_limit_bytes=int(vmem_limit)),
        cost_estimate=pl.CostEstimate(flops=flops, transcendentals=0,
                                      bytes_accessed=x_bytes + weight_bytes + out_bytes),
    )(x_p, prep["w1"], prep["w2"], prep["w3"], prep["bias"])

    logits = out_pad[:B, half:half + n_classes]
    enc = out_pad[:B, :half]
    return logits, enc


def init_params(key, interm_size=32, in_features=768):
    """Deterministic synthetic parameters matching SeqModel.__init__ shapes.

    PyTorch Linear weight is [out, in]; we store the transpose [in, out]."""
    half = interm_size >> 1
    k1, k2, k3, k4, k5, k6 = jax.random.split(key, 6)
    scale1 = 1.0 / jnp.sqrt(in_features)
    scale2 = 1.0 / jnp.sqrt(interm_size)
    scale3 = 1.0 / jnp.sqrt(half)
    return {
        "w1": jax.random.uniform(k1, (in_features, interm_size), jnp.float32,
                                 -scale1, scale1),
        "b1": jax.random.uniform(k2, (1, interm_size), jnp.float32, -scale1, scale1),
        "w2": jax.random.uniform(k3, (interm_size, half), jnp.float32,
                                 -scale2, scale2),
        "b2": jax.random.uniform(k4, (1, half), jnp.float32, -scale2, scale2),
        "w3": jax.random.uniform(k5, (half, 2), jnp.float32, -scale3, scale3),
        "b3": jax.random.uniform(k6, (1, 2), jnp.float32, -scale3, scale3),
    }


if __name__ == "__main__":
    key = jax.random.PRNGKey(0)
    k_x, k_p = jax.random.split(key)

    B = 2                 # batch
    IN_FEATURES = 768     # transformer hidden size (fixed in the module)
    INTERM = 32           # interm_size

    x = jax.random.normal(k_x, (B, IN_FEATURES), jnp.float32)  # CLS embeddings
    params = init_params(k_p, interm_size=INTERM, in_features=IN_FEATURES)
    prep, meta = prepare_params(params)

    # Single launch producing both logits and the encoding.
    logits, enc = seqmodel_forward(x, prep, meta)
    jax.block_until_ready((logits, enc))

    # Reference mirroring the kernel's compute dtypes (bf16 matmul operands,
    # f32 accumulation / bias / activations).
    def ref(x, p):
        hp = jax.lax.Precision.HIGHEST
        bf = lambda a: a.astype(jnp.bfloat16).astype(jnp.float32)
        h1 = _leaky_relu(jnp.dot(bf(x), bf(p["w1"]), precision=hp) + p["b1"])
        h2 = _leaky_relu(jnp.dot(bf(h1), bf(p["w2"]), precision=hp) + p["b2"])
        return jnp.dot(bf(h2), bf(p["w3"]), precision=hp) + p["b3"], h2

    ref_logits, ref_enc = ref(x, params)
    assert logits.shape == (B, 2) and enc.shape == (B, INTERM >> 1)
    assert jnp.allclose(logits, ref_logits, atol=1e-2, rtol=1e-2), "logits mismatch"
    assert jnp.allclose(enc, ref_enc, atol=1e-2, rtol=1e-2), "encoding mismatch"

    print("KERNEL_OK")
</pallas_src>

<mosaic_0001>
module attributes {stable_mosaic.version = 11 : i64} {
  func.func @seqmodel_head_kernel(%arg0: i32, %arg1: memref<16x768xf32, #tpu.memory_space<vmem>>, %arg2: memref<768x128xbf16, #tpu.memory_space<vmem>>, %arg3: memref<128x128xbf16, #tpu.memory_space<vmem>>, %arg4: memref<128x128xbf16, #tpu.memory_space<vmem>>, %arg5: memref<8x128xf32, #tpu.memory_space<vmem>>, %arg6: memref<16x128xf32, #tpu.memory_space<vmem>>) attributes {dimension_semantics = [#tpu.dimension_semantics<parallel>], iteration_bounds = array<i64: 1>, scalar_prefetch = 0 : i64, scratch_operands = 0 : i64, tpu.core_type = #tpu.core_type<tc>, window_params = [{transform_indices = @transform_0, window_bounds = array<i64: 16, 768>}, {pipeline_mode = #tpu.pipeline_mode<synchronous>, transform_indices = @transform_1, window_bounds = array<i64: 768, 128>}, {pipeline_mode = #tpu.pipeline_mode<synchronous>, transform_indices = @transform_2, window_bounds = array<i64: 128, 128>}, {pipeline_mode = #tpu.pipeline_mode<synchronous>, transform_indices = @transform_3, window_bounds = array<i64: 128, 128>}, {pipeline_mode = #tpu.pipeline_mode<synchronous>, transform_indices = @transform_4, window_bounds = array<i64: 8, 128>}, {transform_indices = @transform_5, window_bounds = array<i64: 16, 128>}]} {
    %c0 = arith.constant 0 : index
    %c0_0 = arith.constant 0 : index
    %0 = vector.load %arg1[%c0, %c0_0] : memref<16x768xf32, #tpu.memory_space<vmem>>, vector<16x768xf32>
    %1 = arith.truncf %0 : vector<16x768xf32> to vector<16x768xbf16>
    %c0_1 = arith.constant 0 : index
    %c0_2 = arith.constant 0 : index
    %2 = vector.load %arg5[%c0_1, %c0_2] : memref<8x128xf32, #tpu.memory_space<vmem>>, vector<1x128xf32>
    %c1 = arith.constant 1 : index
    %c0_3 = arith.constant 0 : index
    %3 = vector.load %arg5[%c1, %c0_3] : memref<8x128xf32, #tpu.memory_space<vmem>>, vector<1x128xf32>
    %c2 = arith.constant 2 : index
    %c0_4 = arith.constant 0 : index
    %4 = vector.load %arg5[%c2, %c0_4] : memref<8x128xf32, #tpu.memory_space<vmem>>, vector<1x128xf32>
    %c0_5 = arith.constant 0 : index
    %c0_6 = arith.constant 0 : index
    %5 = vector.load %arg2[%c0_5, %c0_6] : memref<768x128xbf16, #tpu.memory_space<vmem>>, vector<768x128xbf16>
    %cst = arith.constant dense<0.000000e+00> : vector<16x128xf32>
    %6 = tpu.matmul %1, %5, %cst {dimension_numbers = #tpu.dot_dimension_numbers<[1], [0], [0], [1], [0, 0, 1, 1], [], []>} : vector<16x768xbf16>, vector<768x128xbf16>, vector<16x128xf32> -> vector<16x128xf32>
    %7 = vector.broadcast %2 : vector<1x128xf32> to vector<16x128xf32>
    %8 = arith.addf %6, %7 : vector<16x128xf32>
    %cst_7 = arith.constant 0.000000e+00 : f32
    %9 = vector.broadcast %cst_7 : f32 to vector<16x128xf32>
    %10 = arith.cmpf ogt, %8, %9 : vector<16x128xf32>
    %cst_8 = arith.constant 0.00999999977 : f32
    %11 = vector.broadcast %cst_8 : f32 to vector<16x128xf32>
    %12 = arith.mulf %11, %8 : vector<16x128xf32>
    %13 = arith.select %10, %8, %12 : vector<16x128xi1>, vector<16x128xf32>
    %14 = arith.truncf %13 : vector<16x128xf32> to vector<16x128xbf16>
    %c0_9 = arith.constant 0 : index
    %c0_10 = arith.constant 0 : index
    %15 = vector.load %arg3[%c0_9, %c0_10] : memref<128x128xbf16, #tpu.memory_space<vmem>>, vector<128x128xbf16>
    %cst_11 = arith.constant dense<0.000000e+00> : vector<16x128xf32>
    %16 = tpu.matmul %14, %15, %cst_11 {dimension_numbers = #tpu.dot_dimension_numbers<[1], [0], [0], [1], [0, 0, 1, 1], [], []>} : vector<16x128xbf16>, vector<128x128xbf16>, vector<16x128xf32> -> vector<16x128xf32>
    %17 = vector.broadcast %3 : vector<1x128xf32> to vector<16x128xf32>
    %18 = arith.addf %16, %17 : vector<16x128xf32>
    %cst_12 = arith.constant 0.000000e+00 : f32
    %19 = vector.broadcast %cst_12 : f32 to vector<16x128xf32>
    %20 = arith.cmpf ogt, %18, %19 : vector<16x128xf32>
    %cst_13 = arith.constant 0.00999999977 : f32
    %21 = vector.broadcast %cst_13 : f32 to vector<16x128xf32>
    %22 = arith.mulf %21, %18 : vector<16x128xf32>
    %23 = arith.select %20, %18, %22 : vector<16x128xi1>, vector<16x128xf32>
    %24 = arith.truncf %23 : vector<16x128xf32> to vector<16x128xbf16>
    %c0_14 = arith.constant 0 : index
    %c0_15 = arith.constant 0 : index
    %25 = vector.load %arg4[%c0_14, %c0_15] : memref<128x128xbf16, #tpu.memory_space<vmem>>, vector<128x128xbf16>
    %cst_16 = arith.constant dense<0.000000e+00> : vector<16x128xf32>
    %26 = tpu.matmul %24, %25, %cst_16 {dimension_numbers = #tpu.dot_dimension_numbers<[1], [0], [0], [1], [0, 0, 1, 1], [], []>} : vector<16x128xbf16>, vector<128x128xbf16>, vector<16x128xf32> -> vector<16x128xf32>
    %27 = vector.broadcast %4 : vector<1x128xf32> to vector<16x128xf32>
    %28 = arith.addf %26, %27 : vector<16x128xf32>
    %29 = arith.addf %23, %28 : vector<16x128xf32>
    %c0_17 = arith.constant 0 : index
    %c0_18 = arith.constant 0 : index
    %30 = vector.load %arg6[%c0_17, %c0_18] : memref<16x128xf32, #tpu.memory_space<vmem>>, vector<16x128xf32>
    tpu.vector_store %arg6[%c0_17, %c0_18], %29 {strides = array<i32>} : memref<16x128xf32, #tpu.memory_space<vmem>>, vector<16x128xf32>,
    return
  }
  func.func @transform_0(%arg0: i32) -> (i32, i32) {
    %c0_i32 = arith.constant 0 : i32
    %c0_i32_0 = arith.constant 0 : i32
    return %arg0, %c0_i32 : i32, i32
  }
  func.func @transform_1(%arg0: i32) -> (i32, i32) {
    %c0_i32 = arith.constant 0 : i32
    %c0_i32_0 = arith.constant 0 : i32
    %c0_i32_1 = arith.constant 0 : i32
    return %c0_i32, %c0_i32_0 : i32, i32
  }
  func.func @transform_2(%arg0: i32) -> (i32, i32) {
    %c0_i32 = arith.constant 0 : i32
    %c0_i32_0 = arith.constant 0 : i32
    %c0_i32_1 = arith.constant 0 : i32
    return %c0_i32, %c0_i32_0 : i32, i32
  }
  func.func @transform_3(%arg0: i32) -> (i32, i32) {
    %c0_i32 = arith.constant 0 : i32
    %c0_i32_0 = arith.constant 0 : i32
    %c0_i32_1 = arith.constant 0 : i32
    return %c0_i32, %c0_i32_0 : i32, i32
  }
  func.func @transform_4(%arg0: i32) -> (i32, i32) {
    %c0_i32 = arith.constant 0 : i32
    %c0_i32_0 = arith.constant 0 : i32
    %c0_i32_1 = arith.constant 0 : i32
    return %c0_i32, %c0_i32_0 : i32, i32
  }
  func.func @transform_5(%arg0: i32) -> (i32, i32) {
    %c0_i32 = arith.constant 0 : i32
    %c0_i32_0 = arith.constant 0 : i32
    return %arg0, %c0_i32 : i32, i32
  }
}

</mosaic_0001>

<bundles_post_ra>
// kernel: tpu_custom_call.1
= control target key start
LH: loop header
LB: loop body
LE: loop exit
PB: predicated region body
PF: predicated region fallthrough
CT: control target
= control target key end

     0   :  { %10 = vsyncpa [#allocation3], 0  ;;  %s1396_s0 = inlined_call_operand.hbm [shape: f32[16,768], index: 0, kind: input, shape index: {}]   ;;  %s1397_s1 = inlined_call_operand.hbm [shape: bf16[768,128], index: 1, kind: input, shape index: {}]   ;;  %s1398_s2 = inlined_call_operand.hbm [shape: bf16[128,128], index: 2, kind: input, shape index: {}]   ;;  %s1399_s3 = inlined_call_operand.hbm [shape: bf16[128,128], index: 3, kind: input, shape index: {}]   ;;  %s1400_s4 = inlined_call_operand.vmem [shape: f32[8,128], index: 4, kind: input, shape index: {}]   ;;  %s1401_s5 = inlined_call_operand.hbm [shape: f32[16,128], index: 5, kind: output, shape index: {}]  }
   0x1   :  { %11 = vsyncpa [#allocation6], 0 }
   0x2   :  { %12 = vsyncpa [#allocation9], 0 }
   0x3   :  { %13 = vsyncpa [#allocation4], 0  ;;  %s1250_s18 = smov [#allocation5]   ;;  %s1132_s22 = scalar_lea.hbm %s1397_s1, 6144 }
   0x4   :  { %s31_s19 = sshll.u32 %s1250_s18, 4  ;;  %p1133_p0 = scmp.ne.s32.totalorder %s1397_s1, %s1132_s22  ;;  %s32_s19 = int_to_ptr.vmem [resolvable:$true] %s31_s19 }
   0x5   :  { %p1136_p1 = scmp.lt.u32.totalorder %s1132_s22, %s1397_s1 }
   0x7   :  { %p1138_p2 = pnand %p1136_p1, %p1133_p0 }
   0x9   :  { %1141 = shalt.err (!%p1138_p2)
}
   0xa   :  { %s1142_s27 = scalar_lea.vmem %s32_s19, 6144  ;;  %p1147_p4 = scmp.lt.s32.totalorder %s32_s19, %s32_s19 }
   0xb   :  { %p1143_p3 = scmp.ne.s32.totalorder %s32_s19, %s1142_s27  ;;  %p1148_p5 = scmp.lt.s32.totalorder %s1142_s27, %s1142_s27 }
   0xd   :  { %p1149_p6 = por %p1148_p5, %p1147_p4 }
   0xf   :  { %p1150_p7 = pnand %p1149_p6, %p1143_p3 }
  0x11   :  { %1153 = shalt.err (!%p1150_p7)
}
  0x12   :  { %s1251_s28 = smov 64   ;;  %s1252_s29 = smov 4  }
  0x13   :  { %37 = dma.hbm_to_vmem [thread:$0]  %s1397_s1, 6144, %s32_s19, [#allocation6], %s1251_s28, %s1251_s28, %s1252_s29  }
  0x14   :  { %s1253_s7 = smov [#allocation2]   ;;  %s1154_s11 = scalar_lea.hbm %s1396_s0, 1536 }
  0x15   :  { %s19_s8 = sshll.u32 %s1253_s7, 4  ;;  %p1155_p8 = scmp.ne.s32.totalorder %s1396_s0, %s1154_s11  ;;  %s20_s8 = int_to_ptr.vmem [resolvable:$true] %s19_s8 }
  0x16   :  { %p1158_p9 = scmp.lt.u32.totalorder %s1154_s11, %s1396_s0 }
  0x18   :  { %p1160_p10 = pnand %p1158_p9, %p1155_p8 }
  0x1a   :  { %1163 = shalt.err (!%p1160_p10)
}
  0x1b   :  { %s1164_s16 = scalar_lea.vmem %s20_s8, 1536  ;;  %p1169_p12 = scmp.lt.s32.totalorder %s20_s8, %s20_s8 }
  0x1c   :  { %p1165_p11 = scmp.ne.s32.totalorder %s20_s8, %s1164_s16  ;;  %p1170_p13 = scmp.lt.s32.totalorder %s1164_s16, %s1164_s16 }
  0x1e   :  { %p1171_p0 = por %p1170_p13, %p1169_p12 }
  0x20   :  { %p1172_p1 = pnand %p1171_p0, %p1165_p11 }
  0x22   :  { %1175 = shalt.err (!%p1172_p1)
}
  0x23   :  { %s1254_s1 = smov 768   ;;  %s1255_s17 = smov 48  }
  0x24   :  { %25 = dma.hbm_to_vmem [thread:$0]  %s1396_s0, 1536, %s20_s8, [#allocation3], %s1254_s1, %s1254_s1, %s1255_s17  }
  0x25   :  { %s1256_s20 = smov [#allocation7]   ;;  %s1257_s22 = smov [#allocation8]  }
  0x26   :  { %s43_s21 = sshll.u32 %s1256_s20, 4  ;;  %s55_s23 = sshll.u32 %s1257_s22, 4  ;;  %s44_s21 = int_to_ptr.vmem [resolvable:$true] %s43_s21  ;;  %s1320_s23 = int_to_ptr.vmem [resolvable:$true] %s55_s23 }
  0x27   :  { %s1176_s26 = scalar_lea.hbm %s1398_s2, 1024 }
  0x28   :  { %p1177_p2 = scmp.ne.s32.totalorder %s1398_s2, %s1176_s26  ;;  %p1180_p3 = scmp.lt.u32.totalorder %s1176_s26, %s1398_s2 }
  0x2a   :  { %p1182_p4 = pnand %p1180_p3, %p1177_p2 }
  0x2c   :  { %1185 = shalt.err (!%p1182_p4)
}
  0x2d   :  { %s1186_s0 = scalar_lea.vmem %s44_s21, 1024  ;;  %p1191_p6 = scmp.lt.s32.totalorder %s44_s21, %s44_s21 }
  0x2e   :  { %p1187_p5 = scmp.ne.s32.totalorder %s44_s21, %s1186_s0  ;;  %p1192_p7 = scmp.lt.s32.totalorder %s1186_s0, %s1186_s0 }
  0x30   :  { %p1193_p8 = por %p1192_p7, %p1191_p6 }
  0x32   :  { %p1194_p9 = pnand %p1193_p8, %p1187_p5 }
  0x34   :  { %1197 = shalt.err (!%p1194_p9)
}
  0x35   :  { %49 = dma.hbm_to_vmem [thread:$0]  %s1398_s2, 1024, %s44_s21, [#allocation6], %s1251_s28, %s1251_s28, %s1252_s29  }
  0x36   :  { %s1198_s12 = scalar_lea.hbm %s1399_s3, 1024 }
  0x37   :  { %p1199_p10 = scmp.ne.s32.totalorder %s1399_s3, %s1198_s12  ;;  %p1202_p11 = scmp.lt.u32.totalorder %s1198_s12, %s1399_s3 }
  0x39   :  { %p1204_p12 = pnand %p1202_p11, %p1199_p10 }
  0x3b   :  { %1207 = shalt.err (!%p1204_p12)
}
  0x3c   :  { %s1208_s1 = scalar_lea.vmem %s1320_s23, 1024  ;;  %p1213_p0 = scmp.lt.s32.totalorder %s1320_s23, %s1320_s23 }
  0x3d   :  { %p1209_p13 = scmp.ne.s32.totalorder %s1320_s23, %s1208_s1  ;;  %p1214_p1 = scmp.lt.s32.totalorder %s1208_s1, %s1208_s1 }
  0x3f   :  { %p1215_p2 = por %p1214_p1, %p1213_p0 }
  0x41   :  { %p1216_p3 = pnand %p1215_p2, %p1209_p13 }
  0x43   :  { %1219 = shalt.err (!%p1216_p3)
}
  0x44   :  { %61 = dma.hbm_to_vmem [thread:$0]  %s1399_s3, 1024, %s1320_s23, [#allocation9], %s1251_s28, %s1251_s28, %s1252_s29  }
  0x45   :  { %1242 = dma.done.wait [#allocation3], 1536  }
  0x46   :  { %1243 = vsyncadd [#allocation3], 4294965760 }
  0x47   :  { %1244 = dma.done.wait [#allocation6], 7168  }
  0x48   :  { %1245 = vsyncadd [#allocation6], 4294960128 }
  0x49   :  { %1246 = dma.done.wait [#allocation9], 1024  }
  0x4a   :  { %1247 = vsyncadd [#allocation9], 4294966272  ;;  %v1068_v0 = vld [vmem:[#allocation5 + $0x40] sm:$0xff]   ;;  %v1072_v4 = vld [vmem:[#allocation5 + $0x48] sm:$0xff]   ;;  %vm1259_vm0 = vmmov 0   ;;  %s1260_s21 = smov [#allocation10]  }
  0x4b   :  { %v1069_v1 = vld [vmem:[#allocation5] sm:$0xff]   ;;  %931 = vmatprep.subr.bf16.mxu0 %v1068_v0  ;;  %v1073_v5 = vld [vmem:[#allocation5 + $0x8] sm:$0xff]   ;;  %v1076_v8 = vld [vmem:[#allocation5 + $0x50] sm:$0xff]   ;;  %s850_s22 = sshll.u32 %s1260_s21, 4  ;;  %s851_s22 = int_to_ptr.vmem [resolvable:$true] %s850_s22 }
  0x4c   :  { %v1070_v2 = vld [vmem:[#allocation5 + $0xc0] sm:$0xff]   ;;  %932 = vmatpush3.bf16.msra.mxu0 %v1069_v1  ;;  %v1074_v6 = vld [vmem:[#allocation5 + $0xc8] sm:$0xff]   ;;  %v1077_v9 = vld [vmem:[#allocation5 + $0x10] sm:$0xff]   ;;  %s1220_s23 = scalar_lea.vmem %s851_s22, 256  ;;  %p1225_p5 = scmp.lt.s32.totalorder %s851_s22, %s851_s22 }
  0x4d   :  { %v1071_v3 = vld [vmem:[#allocation5 + $0x80] sm:$0xff]   ;;  %953 = vmatprep.subr.bf16.mxu1 %v1070_v2  ;;  %933 = vmatprep.subr.bf16.mxu0 %v1072_v4  ;;  %v1075_v7 = vld [vmem:[#allocation5 + $0x88] sm:$0xff]   ;;  %v1078_v10 = vld [vmem:[#allocation5 + $0xd0] sm:$0xff]   ;;  %p1221_p4 = scmp.ne.s32.totalorder %s851_s22, %s1220_s23  ;;  %p1226_p6 = scmp.lt.s32.totalorder %s1220_s23, %s1220_s23 }
  0x4e   :  { %954 = vmatpush3.bf16.msra.mxu1 %v1071_v3  ;;  %v1079_v11 = vld [vmem:[#allocation5 + $0x90] sm:$0xff]   ;;  %v1080_v12 = vld [vmem:[#allocation5 + $0x58] sm:$0xff]   ;;  %v1084_v16 = vld [vmem:[#allocation5 + $0x60] sm:$0xff]   ;;  %v1258_v3 = vmov 0.0  }
  0x4f   :  { %955 = vmatprep.subr.bf16.mxu1 %v1074_v6  ;;  %v1081_v13 = vld [vmem:[#allocation5 + $0x18] sm:$0xff]   ;;  %v1085_v17 = vld [vmem:[#allocation5 + $0x20] sm:$0xff]   ;;  %v1088_v20 = vld [vmem:[#allocation5 + $0x68] sm:$0xff]   ;;  %p1227_p7 = por %p1226_p6, %p1225_p5 }
  0x50   :  { %934 = vmatpush3.bf16.msra.mxu0 %v1073_v5  ;;  %v1082_v14 = vld [vmem:[#allocation5 + $0xd8] sm:$0xff]   ;;  %v1086_v18 = vld [vmem:[#allocation5 + $0xe0] sm:$0xff]   ;;  %v1089_v21 = vld [vmem:[#allocation5 + $0x28] sm:$0xff]  }
  0x51   :  { %935 = vmatprep.subr.bf16.mxu0 %v1076_v8  ;;  %v1083_v15 = vld [vmem:[#allocation5 + $0x98] sm:$0xff]   ;;  %v1087_v19 = vld [vmem:[#allocation5 + $0xa0] sm:$0xff]   ;;  %v1090_v22 = vld [vmem:[#allocation5 + $0xe8] sm:$0xff]   ;;  %p1228_p8 = pnand %p1227_p7, %p1221_p4 }
  0x52   :  { %956 = vmatpush3.bf16.msra.mxu1 %v1075_v7  ;;  %v1091_v23 = vld [vmem:[#allocation5 + $0xa8] sm:$0xff]   ;;  %v1092_v24 = vld [vmem:[#allocation5 + $0x70] sm:$0xff]   ;;  %v1096_v28 = vld [vmem:[#allocation5 + $0x78] sm:$0xff]  }
  0x53   :  { %957 = vmatprep.subr.bf16.mxu1 %v1078_v10  ;;  %v1093_v25 = vld [vmem:[#allocation5 + $0x30] sm:$0xff]   ;;  %v1097_v29 = vld [vmem:[#allocation5 + $0x38] sm:$0xff]   ;;  %v78_v31 = vld [vmem:[#allocation2 + $0x8] sm:$0xff] }
  0x54   :  { %936 = vmatpush3.bf16.msra.mxu0 %v1077_v9  ;;  %v1094_v26 = vld [vmem:[#allocation5 + $0xf0] sm:$0xff]   ;;  %v1098_v30 = vld [vmem:[#allocation5 + $0xf8] sm:$0xff]   ;;  %v77_v35 = vld [vmem:[#allocation2] sm:$0xff] }
  0x55   :  { %937 = vmatprep.subr.bf16.mxu0 %v1080_v12  ;;  %v1095_v27 = vld [vmem:[#allocation5 + $0xb0] sm:$0xff]   ;;  %v84_v32 = vld [vmem:[#allocation2 + $0x38] sm:$0xff]  ;;  %v1100_v38 = vld [vmem:[#allocation5 + $0x140] sm:$0xff]  }
  0x56   :  { %958 = vmatpush3.bf16.msra.mxu1 %v1079_v11  ;;  %v90_v33 = vpack.c.bf16 %v84_v32, %v78_v31  ;;  %v1099_v34 = vld [vmem:[#allocation5 + $0xb8] sm:$0xff]   ;;  %v83_v36 = vld [vmem:[#allocation2 + $0x30] sm:$0xff]  ;;  %v86_v40 = vld [vmem:[#allocation2 + $0x48] sm:$0xff] }
  0x57   :  { %959 = vmatprep.subr.bf16.mxu1 %v1082_v14  ;;  %v89_v37 = vpack.c.bf16 %v83_v36, %v77_v35  ;;  %v80_v39 = vld [vmem:[#allocation2 + $0x18] sm:$0xff]  ;;  %v1101_v42 = vld [vmem:[#allocation5 + $0x100] sm:$0xff]   ;;  %v79_v43 = vld [vmem:[#allocation2 + $0x10] sm:$0xff] }
  0x58   :  { %938 = vmatpush3.bf16.msra.mxu0 %v1081_v13  ;;  %518 = vmatprep.mubr.bf16.mxu0 %v90_v33  ;;  %v92_v41 = vpack.c.bf16 %v86_v40, %v80_v39  ;;  %v85_v44 = vld [vmem:[#allocation2 + $0x40] sm:$0xff]  ;;  %v1102_v46 = vld [vmem:[#allocation5 + $0x148] sm:$0xff]   ;;  %v1104_v48 = vld [vmem:[#allocation5 + $0x150] sm:$0xff]  }
  0x59   :  { %939 = vmatprep.subr.bf16.mxu0 %v1084_v16  ;;  %v91_v45 = vpack.c.bf16 %v85_v44, %v79_v43  ;;  %v1103_v47 = vld [vmem:[#allocation5 + $0x108] sm:$0xff]   ;;  %v1105_v49 = vld [vmem:[#allocation5 + $0x110] sm:$0xff]   ;;  %v1106_v50 = vld [vmem:[#allocation5 + $0x158] sm:$0xff]  }
  0x5a   :  { %960 = vmatpush3.bf16.msra.mxu1 %v1083_v15  ;;  %559 = vmatprep.mubr.bf16.mxu1 %v92_v41  ;;  %v1107_v51 = vld [vmem:[#allocation5 + $0x118] sm:$0xff]   ;;  %v1108_v52 = vld [vmem:[#allocation5 + $0x160] sm:$0xff]   ;;  %v1110_v54 = vld [vmem:[#allocation5 + $0x168] sm:$0xff]  }
  0x5b   :  { %961 = vmatprep.subr.bf16.mxu1 %v1086_v18  ;;  %v1109_v53 = vld [vmem:[#allocation5 + $0x120] sm:$0xff]   ;;  %v82_v55 = vld [vmem:[#allocation2 + $0x28] sm:$0xff]  ;;  %v88_v57 = vld [vmem:[#allocation2 + $0x58] sm:$0xff] }
  0x5c   :  { %940 = vmatpush3.bf16.msra.mxu0 %v1085_v17  ;;  %v1111_v56 = vld [vmem:[#allocation5 + $0x128] sm:$0xff]   ;;  %v1112_v58 = vld [vmem:[#allocation5 + $0x170] sm:$0xff]   ;;  %v94_v59 = vpack.c.bf16 %v88_v57, %v82_v55  ;;  %v1114_v61 = vld [vmem:[#allocation5 + $0x178] sm:$0xff]  }
  0x5d   :  { %941 = vmatprep.subr.bf16.mxu0 %v1088_v20  ;;  %v1113_v60 = vld [vmem:[#allocation5 + $0x130] sm:$0xff]   ;;  %v1115_v62 = vld [vmem:[#allocation5 + $0x138] sm:$0xff]   ;;  %v81_v63 = vld [vmem:[#allocation2 + $0x20] sm:$0xff] }
  0x5e   :  { %962 = vmatpush3.bf16.msra.mxu1 %v1087_v19  ;;  %v87_v0 = vld [vmem:[#allocation2 + $0x50] sm:$0xff]  ;;  %v1116_v2 = vld [vmem:[#allocation7] sm:$0xff]   ;;  %v1117_v4 = vld [vmem:[#allocation7 + $0x8] sm:$0xff]  }
  0x5f   :  { %963 = vmatprep.subr.bf16.mxu1 %v1090_v22  ;;  %v93_v1 = vpack.c.bf16 %v87_v0, %v81_v63  ;;  %v1118_v5 = vld [vmem:[#allocation7 + $0x10] sm:$0xff]   ;;  %v1119_v6 = vld [vmem:[#allocation7 + $0x18] sm:$0xff]   ;;  %v1120_v7 = vld [vmem:[#allocation7 + $0x20] sm:$0xff]  }
  0x60   :  { %942 = vmatpush3.bf16.msra.mxu0 %v1089_v21  ;;  %v1121_v8 = vld [vmem:[#allocation7 + $0x28] sm:$0xff]   ;;  %v1122_v9 = vld [vmem:[#allocation7 + $0x30] sm:$0xff]   ;;  %v1123_v10 = vld [vmem:[#allocation7 + $0x38] sm:$0xff]  }
  0x61   :  { %943 = vmatprep.subr.bf16.mxu0 %v1092_v24  ;;  %v1124_v11 = vld [vmem:[#allocation8] sm:$0xff]   ;;  %v1125_v12 = vld [vmem:[#allocation8 + $0x8] sm:$0xff]   ;;  %v1126_v13 = vld [vmem:[#allocation8 + $0x10] sm:$0xff]  }
  0x62   :  { %964 = vmatpush3.bf16.msra.mxu1 %v1091_v23  ;;  %v1127_v14 = vld [vmem:[#allocation8 + $0x18] sm:$0xff]   ;;  %v1128_v15 = vld [vmem:[#allocation8 + $0x20] sm:$0xff]   ;;  %v1129_v16 = vld [vmem:[#allocation8 + $0x28] sm:$0xff]  }
  0x63   :  { %965 = vmatprep.subr.bf16.mxu1 %v1094_v26  ;;  %v864_v18 = vld [vmem:[%s1400_s4] ss:$0 sm:$0xff] }
  0x64   :  { %944 = vmatpush3.bf16.msra.mxu0 %v1093_v25 }
  0x65   :  { %945 = vmatprep.subr.bf16.mxu0 %v1096_v28 }
  0x66   :  { %966 = vmatpush3.bf16.msra.mxu1 %v1095_v27 }
  0x67   :  { %967 = vmatprep.subr.bf16.mxu1 %v1098_v30 }
  0x68   :  { %946 = vmatpush3.bf16.msra.mxu0 %v1097_v29 }
  0x69   :  { %975 = vmatprep.subr.bf16.mxu0 %v1100_v38 }
  0x6a   :  { %968 = vmatpush3.bf16.msra.mxu1 %v1099_v34 }
  0x6b   :  { %519 = vmatmul.mubr.bf16.vlgmr.msra.gmra.mrb[0].mxu0 %v89_v37  ;;  %1015 = vmatprep.subr.bf16.mxu1 %v1258_v3 }
  0x6c   :  { %976 = vmatpush3.bf16.msra.mxu0 %v1101_v42  ;;  %600 = vmatprep.mubr.bf16.mxu0 %v94_v59 }
  0x6d   :  { %560 = vmatmul.mubr.bf16.vlgmr.msra.gmra.mrb[0].mxu1 %v91_v45  ;;  %977 = vmatprep.subr.bf16.mxu0 %v1102_v46 }
  0x6e   :  { %1016 = vmatpush3.bf16.msra.mxu1 %v1116_v2  ;;  %1031 = vmatprep.mubr.msk.bf16.mxu1 %vm1259_vm0, %v1258_v3 }
  0x6f   :  { %1017 = vmatprep.subr.bf16.mxu1 %v1258_v3 }
  0x70   :  { %978 = vmatpush3.bf16.msra.mxu0 %v1103_v47  ;;  %v1130_v47 = vld [vmem:[#allocation8 + $0x30] sm:$0xff]  }
  0x71   :  { %979 = vmatprep.subr.bf16.mxu0 %v1104_v48  ;;  %v1131_v48 = vld [vmem:[#allocation8 + $0x38] sm:$0xff]  }
  0x72   :  { %1018 = vmatpush3.bf16.msra.mxu1 %v1117_v4 }
  0x73   :  { %1019 = vmatprep.subr.bf16.mxu1 %v1258_v3 }
  0x74   :  { %980 = vmatpush3.bf16.msra.mxu0 %v1105_v49  ;;  %v913_v49 = vld [vmem:[%s1400_s4 + $0x1] ss:$0 sm:$0xff] }
  0x75   :  { %981 = vmatprep.subr.bf16.mxu0 %v1106_v50 }
  0x76   :  { %1020 = vmatpush3.bf16.msra.mxu1 %v1118_v5 }
  0x77   :  { %1021 = vmatprep.subr.bf16.mxu1 %v1258_v3 }
  0x78   :  { %982 = vmatpush3.bf16.msra.mxu0 %v1107_v51 }
  0x79   :  { %983 = vmatprep.subr.bf16.mxu0 %v1108_v52 }
  0x7a   :  { %1022 = vmatpush3.bf16.msra.mxu1 %v1119_v6 }
  0x7b   :  { %1023 = vmatprep.subr.bf16.mxu1 %v1258_v3 }
  0x7c   :  { %984 = vmatpush3.bf16.msra.mxu0 %v1109_v53 }
  0x7d   :  { %985 = vmatprep.subr.bf16.mxu0 %v1110_v54 }
  0x7e   :  { %1024 = vmatpush3.bf16.msra.mxu1 %v1120_v7 }
  0x7f   :  { %1025 = vmatprep.subr.bf16.mxu1 %v1258_v3 }
  0x80   :  { %986 = vmatpush3.bf16.msra.mxu0 %v1111_v56 }
  0x81   :  { %987 = vmatprep.subr.bf16.mxu0 %v1112_v58 }
  0x82   :  { %1026 = vmatpush3.bf16.msra.mxu1 %v1121_v8 }
  0x83   :  { %1027 = vmatprep.subr.bf16.mxu1 %v1258_v3 }
  0x84   :  { %988 = vmatpush3.bf16.msra.mxu0 %v1113_v60 }
  0x85   :  { %989 = vmatprep.subr.bf16.mxu0 %v1114_v61  ;;  %v922_v61 = vld [vmem:[%s1400_s4 + $0x2] ss:$0 sm:$0xff] }
  0x86   :  { %1028 = vmatpush3.bf16.msra.mxu1 %v1122_v9 }
  0x87   :  { %1029 = vmatprep.subr.bf16.mxu1 %v1258_v3 }
  0x88   :  { %990 = vmatpush3.bf16.msra.mxu0 %v1115_v62 }
  0x89   :  { %1035 = vmatprep.subr.bf16.mxu0 %v1258_v3 }
  0x8a   :  { %1030 = vmatpush3.bf16.msra.mxu1 %v1123_v10 }
  0x8b   :  { %601 = vmatmul.mubr.bf16.vlgmr.msra.gmra.mrb[4].mxu0 %v93_v1 }
  0x8c   :  { %1051 = vmatprep.mubr.msk.bf16.mxu0 %vm1259_vm0, %v1258_v3  ;;  %1036 = vmatpush3.bf16.msra.mxu0 %v1124_v11 }
  0x8d   :  { %1037 = vmatprep.subr.bf16.mxu0 %v1258_v3 }
  0x90   :  { %1038 = vmatpush3.bf16.msra.mxu0 %v1125_v12 }
  0x91   :  { %1039 = vmatprep.subr.bf16.mxu0 %v1258_v3 }
  0x94   :  { %1040 = vmatpush3.bf16.msra.mxu0 %v1126_v13 }
  0x95   :  { %1041 = vmatprep.subr.bf16.mxu0 %v1258_v3 }
  0x98   :  { %1042 = vmatpush3.bf16.msra.mxu0 %v1127_v14 }
  0x99   :  { %1043 = vmatprep.subr.bf16.mxu0 %v1258_v3 }
  0x9c   :  { %1044 = vmatpush3.bf16.msra.mxu0 %v1128_v15 }
  0x9d   :  { %1045 = vmatprep.subr.bf16.mxu0 %v1258_v3 }
  0xa0   :  { %1046 = vmatpush3.bf16.msra.mxu0 %v1129_v16 }
  0xa1   :  { %1047 = vmatprep.subr.bf16.mxu0 %v1258_v3 }
  0xa4   :  { %1048 = vmatpush3.bf16.msra.mxu0 %v1130_v47 }
  0xa5   :  { %1049 = vmatprep.subr.bf16.mxu0 %v1258_v3 }
  0xa8   :  { %1050 = vmatpush3.bf16.msra.mxu0 %v1131_v48 }
 0x13e   :  { %v947_v17 = vpop.f32.mrb[0].mxu0 }
 0x13f   :  { %v948_v19 = vpop.f32.mrb[1].mxu0 }
 0x140   :  { %v949_v20 = vadd.f32 %v948_v19, %v947_v17  ;;  %v950_v21 = vpop.f32.mrb[2].mxu0  ;;  %v969_v22 = vpop.f32.mrb[0].mxu1 }
 0x141   :  { %v951_v23 = vpop.f32.mrb[3].mxu0  ;;  %v970_v26 = vpop.f32.mrb[1].mxu1 }
 0x142   :  { %v521_v24 = vadd.f32 %v949_v20, %v864_v18  ;;  %v952_v25 = vadd.f32 %v951_v23, %v950_v21  ;;  %v971_v27 = vadd.f32 %v970_v26, %v969_v22  ;;  %v972_v28 = vpop.f32.mrb[2].mxu1 }
 0x143   :  { %v973_v30 = vpop.f32.mrb[3].mxu1 }
 0x144   :  { %v524_v29 = vadd.f32 %v952_v25, %v864_v18  ;;  %v562_v31 = vadd.f32 %v971_v27, %v521_v24  ;;  %v974_v32 = vadd.f32 %v973_v30, %v972_v28 }
 0x146   :  { %v565_v33 = vadd.f32 %v974_v32, %v524_v29 }
 0x15e   :  { %v991_v34 = vpop.f32.mrb[4].mxu0 }
 0x15f   :  { %v992_v35 = vpop.f32.mrb[5].mxu0 }
 0x160   :  { %v993_v36 = vadd.f32 %v992_v35, %v991_v34  ;;  %v994_v37 = vpop.f32.mrb[6].mxu0 }
 0x161   :  { %v995_v38 = vpop.f32.mrb[7].mxu0 }
 0x162   :  { %v603_v39 = vadd.f32 %v993_v36, %v562_v31  ;;  %v996_v40 = vadd.f32 %v995_v38, %v994_v37 }
 0x164   :  { %v611_v41 = vmul.f32 0.01, %v603_v39  ;;  %v606_v42 = vadd.f32 %v996_v40, %v565_v33  ;;  %vm609_vm1 = vcmp.gt.f32.partialorder %v603_v39, 0.0 }
 0x166   :  { %vm610_vm2 = vcmp.gt.f32.partialorder %v606_v42, 0.0  ;;  %v612_v43 = vmul.f32 0.01, %v606_v42  ;;  %v613_v44 = vsel %vm609_vm1, %v603_v39, %v611_v41 }
 0x168   :  { %v614_v45 = vsel %vm610_vm2, %v606_v42, %v612_v43 }
 0x169   :  { %v615_v46 = vpack.c.bf16 %v614_v45, %v613_v44 }
 0x16b   :  { %1032 = vmatmul.mubr.bf16.vlgmr.msra.gmra.mrb[4].mxu1 %v615_v46 }
 0x23e   :  { %v718_v50 = vpop.f32.mrb[4].mxu1 }
 0x23f   :  { %v719_v51 = vadd.f32 %v913_v49, %v718_v50  ;;  %v1033_v52 = vpop.f32.mrb[5].mxu1 }
 0x240   :  { %v721_v53 = vpop.f32.mrb[6].mxu1 }
 0x241   :  { %v727_v54 = vmul.f32 0.01, %v719_v51  ;;  %v722_v55 = vadd.f32 %v913_v49, %v721_v53  ;;  %v1034_v56 = vpop.f32.mrb[7].mxu1  ;;  %vm725_vm3 = vcmp.gt.f32.partialorder %v719_v51, 0.0 }
 0x243   :  { %vm726_vm4 = vcmp.gt.f32.partialorder %v722_v55, 0.0  ;;  %v728_v57 = vmul.f32 0.01, %v722_v55  ;;  %v729_v58 = vsel %vm725_vm3, %v719_v51, %v727_v54 }
 0x245   :  { %v730_v59 = vsel %vm726_vm4, %v722_v55, %v728_v57 }
 0x246   :  { %v731_v60 = vpack.c.bf16 %v730_v59, %v729_v58 }
 0x248   :  { %1052 = vmatmul.mubr.bf16.vlgmr.msra.gmra.mrb[8].mxu0 %v731_v60 }
 0x31b   :  { %v834_v62 = vpop.f32.mrb[8].mxu0 }
 0x31c   :  { %v835_v63 = vadd.f32 %v922_v61, %v834_v62  ;;  %v1053_v0 = vpop.f32.mrb[9].mxu0 }
 0x31d   :  { %v837_v1 = vpop.f32.mrb[10].mxu0 }
 0x31e   :  { %v841_v2 = vadd.f32 %v835_v63, %v729_v58  ;;  %v838_v3 = vadd.f32 %v922_v61, %v837_v1  ;;  %v1054_v4 = vpop.f32.mrb[11].mxu0 }
 0x320   :  { %843 = vst [vmem:[#allocation10] sm:$0xff] %v841_v2  ;;  %v842_v5 = vadd.f32 %v838_v3, %v730_v59 }
 0x322   :  { %844 = vst [vmem:[#allocation10 + $0x8] sm:$0xff] %v842_v5 }
 0x323   :  { %1231 = shalt.err (!%p1228_p8)
}
 0x324   :  { %s1232_s25 = scalar_lea.hbm %s1401_s5, 256 }
 0x325   :  { %p1233_p9 = scmp.ne.s32.totalorder %s1401_s5, %s1232_s25  ;;  %p1236_p10 = scmp.lt.u32.totalorder %s1232_s25, %s1401_s5 }
 0x327   :  { %p1238_p11 = pnand %p1236_p10, %p1233_p9 }
 0x329   :  { %1241 = shalt.err (!%p1238_p11)
}
 0x32a   :  { %s1261_s7 = smov 128   ;;  %s1262_s0 = smov 8  }
 0x32b   :  { %856 = dma.vmem_to_hbm [thread:$0]  %s851_s22, 256, %s1401_s5, [#allocation4], %s1261_s7, %s1261_s7, %s1262_s0  }
 0x32c   :  { %1248 = dma.done.wait [#allocation4], 256  }
 0x32d   :  { %1249 = vsyncadd [#allocation4], 4294967040 }
 0x32e   :  { %860 = vsyncpa [#allocation3], 1 }
 0x32f   :  { %861 = vsyncpa [#allocation6], 1 }
 0x330   :  { %862 = vsyncpa [#allocation9], 1 }
 0x331   :  { %863 = vsyncpa [#allocation4], 1 }

</bundles_post_ra>
